<compile_context>
chip_gen: v6e
topology: v6e:2x2x1
jax: 0.10.0
libtpu: 0.0.40
codegen_flags: <defaults>
</compile_context>

<pallas_src>
import functools

import jax
import jax.numpy as jnp
from jax.experimental import pallas as pl
from jax.experimental.pallas import tpu as pltpu

ECHAR = 50  # character embedding size (fixed to 50 in the PyTorch module)


def _round_up(x, m):
    return ((x + m - 1) // m) * m


def char_cnn_kernel(ids_ref, wf_ref, b_ref, o_ref, *, K, Vp):
    """Fused one-hot gather + Conv1d(valid) + max-over-time + bias + ReLU.

    ids_ref: (TB, L)          int32 character ids (one batch tile)
    wf_ref:  (K*Vp, Cout_p)   bf16 folded weight, row k*Vp+v = emb[v] @ w[k]
    b_ref:   (1, Cout_p)      f32 conv bias (padded)
    o_ref:   (TB, Cout_p)     f32 output tile
    """
    TB, L = ids_ref.shape
    Lout = L - K + 1

    # 2-D ids block; add the broadcast axis in-register (review item 1).
    ids = ids_ref[...][:, :, None]                       # (TB, L, 1) int32
    iota_v = jax.lax.broadcasted_iota(jnp.int32, (TB, Lout, Vp), 2)

    # im2col one-hot: lane block k holds onehot(ids[:, k:k+Lout]).  bool->bf16
    # cast directly (no jnp.where vselect); 0/1 are exact in bf16.
    chunks = [
        (ids[:, k:k + Lout, :] == iota_v).astype(wf_ref.dtype)   # (TB, Lout, Vp)
        for k in range(K)
    ]
    x2 = jnp.concatenate(chunks, axis=-1)                # (TB, Lout, K*Vp), 128-aligned concat

    # Single MXU matmul = embedding gather + all K conv taps, f32 accumulation
    # inside the MXU (no f32 VPU add chain, no spilled accumulator).
    conv = jax.lax.dot_general(
        x2, wf_ref[...],
        dimension_numbers=(((2,), (0,)), ((), ())),
        preferred_element_type=jnp.float32)              # (TB, Lout, Cout_p)

    # Epilogue: max-over-time first, then per-channel bias + ReLU (equivalent).
    m = jnp.max(conv, axis=1)                            # (TB, Cout_p)
    o_ref[...] = jnp.maximum(m + b_ref[...], 0.0).astype(o_ref.dtype)


def init_params(key, vocab_size, embed_size, kernel, pad_idx):
    """Deterministic parameter init matching the PyTorch module's shapes.

    The Embedding table is folded into the Conv1d weight (both are linear, so
    the math is identical); the fold is done in f32 and stored bf16.  A real
    PyTorch checkpoint's Embedding.weight / Conv1d.weight / Conv1d.bias would
    be folded the same way.
    """
    k1, k2, k3 = jax.random.split(key, 3)
    # Cout padding: 128-lane minimum for lane-dense stores; 256 granularity for
    # larger configs to match the v6e/v7x MXU column width (review item 9).
    cout_p = _round_up(embed_size, 128) if embed_size <= 128 else _round_up(embed_size, 256)
    vp = _round_up(vocab_size, 128)      # 128-aligned so lane-concat of chunks is tile-aligned

    emb = jax.random.normal(k1, (vocab_size, ECHAR), jnp.float32) * 0.1
    emb = emb.at[pad_idx].set(0.0)                       # padding_idx row is zero

    # PyTorch Conv1d weight is (C_out, C_in, K); reorder to (K, C_in, C_out).
    w_torch = jax.random.normal(k2, (embed_size, ECHAR, kernel), jnp.float32) * 0.05
    w = jnp.transpose(w_torch, (2, 1, 0))                # (K, Cin, Cout)

    b = jax.random.normal(k3, (embed_size,), jnp.float32) * 0.05

    # Fold: w_fold[k, v, c] = sum_ci emb[v, ci] * w[k, ci, c]
    w_fold = jnp.einsum("vi,kic->kvc", emb, w,
                        precision=jax.lax.Precision.HIGHEST)         # (K, V, Cout)
    w_fold = jnp.pad(w_fold, ((0, 0), (0, vp - vocab_size), (0, cout_p - embed_size)))
    wf = w_fold.reshape(kernel * vp, cout_p).astype(jnp.bfloat16)    # (K*Vp, Cout_p)

    bias = jnp.pad(b, (0, cout_p - embed_size)).reshape(1, cout_p)   # f32

    return {
        "wf": wf,
        "b": bias,
        "embed_size": embed_size,
        "kernel": kernel,
        "vocab_padded": vp,
    }


def cnn_baseline_forward(params, input_ids, *, block_b=256):
    """Forward pass. input_ids: int (B, L). Returns float32 (B, embed_size)."""
    wf, bias = params["wf"], params["b"]
    embed_size = params["embed_size"]
    K = params["kernel"]
    Vp = params["vocab_padded"]
    cout_p = wf.shape[1]
    B, L = input_ids.shape
    assert L >= K, f"word length L={L} must be >= conv kernel size K={K}"

    # Batch tiling: multiple of 8 sublanes; guarantee >= 2 grid steps whenever
    # the padded batch allows it so v7x's second TensorCore gets work.
    # block_b can be swept upward (512-1024) on big batches if VMEM allows.
    b8 = _round_up(max(B, 1), 8)
    tb_cap = _round_up(b8 // 2, 8) if b8 >= 16 else b8
    TB = max(8, min(_round_up(block_b, 8), tb_cap))
    Bp = _round_up(b8, TB)

    ids = input_ids.astype(jnp.int32)
    if Bp != B:
        ids = jnp.pad(ids, ((0, Bp - B), (0, 0)))        # padded rows sliced off below

    kernel_fn = functools.partial(char_cnn_kernel, K=K, Vp=Vp)

    out = pl.pallas_call(
        kernel_fn,
        out_shape=jax.ShapeDtypeStruct((Bp, cout_p), jnp.float32),
        grid_spec=pltpu.PrefetchScalarGridSpec(
            num_scalar_prefetch=0,
            grid=(Bp // TB,),
            in_specs=[
                pl.BlockSpec((TB, L), lambda i: (i, 0)),     # ids, tiled over batch (2-D)
                pl.BlockSpec(wf.shape, lambda i: (0, 0)),    # folded weight, resident
                pl.BlockSpec(bias.shape, lambda i: (0, 0)),  # bias, resident
            ],
            out_specs=pl.BlockSpec((TB, cout_p), lambda i: (i, 0)),
        ),
        compiler_params=pltpu.CompilerParams(
            dimension_semantics=("parallel",),               # shards across TCs on v7x
            vmem_limit_bytes=32 * 1024 * 1024,               # safe on v5e/v6e/v7x
        ),
    )(ids, wf, bias)

    # TODO(synk): nn.Dropout(0.3) is identity in eval mode; training-mode RNG dropout not applied.
    return out[:B, :embed_size]


if __name__ == "__main__":
    key = jax.random.PRNGKey(0)
    k_params, k_input = jax.random.split(key)

    vocab_size = 30      # len(vocab)
    pad_idx = 0          # vocab['<pad>']
    embed_size = 32
    kernel = 5
    batch, seq = 2, 16   # (B, L) of character indices per word

    params = init_params(k_params, vocab_size, embed_size, kernel, pad_idx)
    input_ids = jax.random.randint(k_input, (batch, seq), 0, vocab_size, dtype=jnp.int32)

    out = cnn_baseline_forward(params, input_ids)
    out = jax.block_until_ready(out)
    assert out.shape == (batch, embed_size) and out.dtype == jnp.float32

    # Reference in the original PyTorch op order (conv + bias -> ReLU -> max),
    # using the same bf16-rounded folded parameters the kernel sees.
    Vp = params["vocab_padded"]
    cout_p = params["wf"].shape[1]
    w_fold = params["wf"].astype(jnp.float32).reshape(kernel, Vp, cout_p)
    w_fold = w_fold[:, :vocab_size, :embed_size]            # (K, V, E)
    b_f = params["b"][0, :embed_size]
    Lout = seq - kernel + 1
    conv = jnp.zeros((batch, Lout, embed_size), jnp.float32)
    for k in range(kernel):
        oh = jax.nn.one_hot(input_ids[:, k:k + Lout], vocab_size, dtype=jnp.float32)
        conv = conv + jnp.einsum("blv,ve->ble", oh, w_fold[k],
                                 precision=jax.lax.Precision.HIGHEST)
    ref = jnp.max(jnp.maximum(conv + b_f[None, None, :], 0.0), axis=1)
    assert jnp.allclose(out, ref, atol=1e-3, rtol=1e-3)

    print("KERNEL_OK")
</pallas_src>

<mosaic_0001>
module attributes {stable_mosaic.version = 11 : i64} {
  func.func @char_cnn_kernel(%arg0: i32, %arg1: memref<8x16xi32, #tpu.memory_space<vmem>>, %arg2: memref<640x128xbf16, #tpu.memory_space<vmem>>, %arg3: memref<1x128xf32, #tpu.memory_space<vmem>>, %arg4: memref<8x128xf32, #tpu.memory_space<vmem>>) attributes {dimension_semantics = [#tpu.dimension_semantics<parallel>], iteration_bounds = array<i64: 1>, scalar_prefetch = 0 : i64, scratch_operands = 0 : i64, tpu.core_type = #tpu.core_type<tc>, window_params = [{transform_indices = @transform_0, window_bounds = array<i64: 8, 16>}, {pipeline_mode = #tpu.pipeline_mode<synchronous>, transform_indices = @transform_1, window_bounds = array<i64: 640, 128>}, {pipeline_mode = #tpu.pipeline_mode<synchronous>, transform_indices = @transform_2, window_bounds = array<i64: 1, 128>}, {transform_indices = @transform_3, window_bounds = array<i64: 8, 128>}]} {
    %c0 = arith.constant 0 : index
    %c0_0 = arith.constant 0 : index
    %0 = vector.load %arg1[%c0, %c0_0] : memref<8x16xi32, #tpu.memory_space<vmem>>, vector<8x16xi32>
    %1 = vector.shape_cast %0 : vector<8x16xi32> to vector<8x16x1xi32>
    %2 = tpu.iota {dimensions = array<i32: 2>} : vector<8x12x128xi32>
    %3 = vector.extract_strided_slice %1 {offsets = [0, 0, 0], sizes = [8, 12, 1], strides = [1, 1, 1]} : vector<8x16x1xi32> to vector<8x12x1xi32>
    %4 = vector.broadcast %3 : vector<8x12x1xi32> to vector<8x12x128xi32>
    %5 = arith.cmpi eq, %4, %2 : vector<8x12x128xi32>
    %6 = arith.extui %5 : vector<8x12x128xi1> to vector<8x12x128xi32>
    %7 = arith.sitofp %6 : vector<8x12x128xi32> to vector<8x12x128xf32>
    %8 = arith.truncf %7 : vector<8x12x128xf32> to vector<8x12x128xbf16>
    %9 = vector.extract_strided_slice %1 {offsets = [0, 1, 0], sizes = [8, 12, 1], strides = [1, 1, 1]} : vector<8x16x1xi32> to vector<8x12x1xi32>
    %10 = vector.broadcast %9 : vector<8x12x1xi32> to vector<8x12x128xi32>
    %11 = arith.cmpi eq, %10, %2 : vector<8x12x128xi32>
    %12 = arith.extui %11 : vector<8x12x128xi1> to vector<8x12x128xi32>
    %13 = arith.sitofp %12 : vector<8x12x128xi32> to vector<8x12x128xf32>
    %14 = arith.truncf %13 : vector<8x12x128xf32> to vector<8x12x128xbf16>
    %15 = vector.extract_strided_slice %1 {offsets = [0, 2, 0], sizes = [8, 12, 1], strides = [1, 1, 1]} : vector<8x16x1xi32> to vector<8x12x1xi32>
    %16 = vector.broadcast %15 : vector<8x12x1xi32> to vector<8x12x128xi32>
    %17 = arith.cmpi eq, %16, %2 : vector<8x12x128xi32>
    %18 = arith.extui %17 : vector<8x12x128xi1> to vector<8x12x128xi32>
    %19 = arith.sitofp %18 : vector<8x12x128xi32> to vector<8x12x128xf32>
    %20 = arith.truncf %19 : vector<8x12x128xf32> to vector<8x12x128xbf16>
    %21 = vector.extract_strided_slice %1 {offsets = [0, 3, 0], sizes = [8, 12, 1], strides = [1, 1, 1]} : vector<8x16x1xi32> to vector<8x12x1xi32>
    %22 = vector.broadcast %21 : vector<8x12x1xi32> to vector<8x12x128xi32>
    %23 = arith.cmpi eq, %22, %2 : vector<8x12x128xi32>
    %24 = arith.extui %23 : vector<8x12x128xi1> to vector<8x12x128xi32>
    %25 = arith.sitofp %24 : vector<8x12x128xi32> to vector<8x12x128xf32>
    %26 = arith.truncf %25 : vector<8x12x128xf32> to vector<8x12x128xbf16>
    %27 = vector.extract_strided_slice %1 {offsets = [0, 4, 0], sizes = [8, 12, 1], strides = [1, 1, 1]} : vector<8x16x1xi32> to vector<8x12x1xi32>
    %28 = vector.broadcast %27 : vector<8x12x1xi32> to vector<8x12x128xi32>
    %29 = arith.cmpi eq, %28, %2 : vector<8x12x128xi32>
    %30 = arith.extui %29 : vector<8x12x128xi1> to vector<8x12x128xi32>
    %31 = arith.sitofp %30 : vector<8x12x128xi32> to vector<8x12x128xf32>
    %32 = arith.truncf %31 : vector<8x12x128xf32> to vector<8x12x128xbf16>
    %33 = tpu.concatenate %8, %14, %20, %26, %32 in 2 : vector<8x12x128xbf16>, vector<8x12x128xbf16>, vector<8x12x128xbf16>, vector<8x12x128xbf16>, vector<8x12x128xbf16> -> vector<8x12x640xbf16>
    %c0_1 = arith.constant 0 : index
    %c0_2 = arith.constant 0 : index
    %34 = vector.load %arg2[%c0_1, %c0_2] : memref<640x128xbf16, #tpu.memory_space<vmem>>, vector<640x128xbf16>
    %cst = arith.constant dense<0.000000e+00> : vector<8x12x128xf32>
    %35 = tpu.matmul %33, %34, %cst {dimension_numbers = #tpu.dot_dimension_numbers<[2], [0], [0, 1], [1], [0, 0, 0, 1, 1, 1], [], []>} : vector<8x12x640xbf16>, vector<640x128xbf16>, vector<8x12x128xf32> -> vector<8x12x128xf32>
    %cst_3 = arith.constant dense<0xFF800000> : vector<8x128xf32>
    %36 = vector.multi_reduction <maximumf>, %35, %cst_3 [1] : vector<8x12x128xf32> to vector<8x128xf32>
    %c0_4 = arith.constant 0 : index
    %c0_5 = arith.constant 0 : index
    %37 = vector.load %arg3[%c0_4, %c0_5] : memref<1x128xf32, #tpu.memory_space<vmem>>, vector<1x128xf32>
    %38 = vector.broadcast %37 : vector<1x128xf32> to vector<8x128xf32>
    %39 = arith.addf %36, %38 : vector<8x128xf32>
    %cst_6 = arith.constant 0.000000e+00 : f32
    %40 = vector.broadcast %cst_6 : f32 to vector<8x128xf32>
    %41 = arith.maximumf %39, %40 : vector<8x128xf32>
    %c0_7 = arith.constant 0 : index
    %c0_8 = arith.constant 0 : index
    %42 = vector.load %arg4[%c0_7, %c0_8] : memref<8x128xf32, #tpu.memory_space<vmem>>, vector<8x128xf32>
    tpu.vector_store %arg4[%c0_7, %c0_8], %41 {strides = array<i32>} : memref<8x128xf32, #tpu.memory_space<vmem>>, vector<8x128xf32>,
    return
  }
  func.func @transform_0(%arg0: i32) -> (i32, i32) {
    %c0_i32 = arith.constant 0 : i32
    %c0_i32_0 = arith.constant 0 : i32
    return %arg0, %c0_i32 : i32, i32
  }
  func.func @transform_1(%arg0: i32) -> (i32, i32) {
    %c0_i32 = arith.constant 0 : i32
    %c0_i32_0 = arith.constant 0 : i32
    %c0_i32_1 = arith.constant 0 : i32
    return %c0_i32, %c0_i32_0 : i32, i32
  }
  func.func @transform_2(%arg0: i32) -> (i32, i32) {
    %c0_i32 = arith.constant 0 : i32
    %c0_i32_0 = arith.constant 0 : i32
    %c0_i32_1 = arith.constant 0 : i32
    return %c0_i32, %c0_i32_0 : i32, i32
  }
  func.func @transform_3(%arg0: i32) -> (i32, i32) {
    %c0_i32 = arith.constant 0 : i32
    %c0_i32_0 = arith.constant 0 : i32
    return %arg0, %c0_i32 : i32, i32
  }
}

</mosaic_0001>

<bundles_post_ra>
// kernel: tpu_custom_call.1
= control target key start
LH: loop header
LB: loop body
LE: loop exit
PB: predicated region body
PF: predicated region fallthrough
CT: control target
= control target key end

     0   :  { %8 = vsyncpa [#allocation3], 0  ;;  %s2429_s0 = inlined_call_operand.hbm [shape: s32[8,16], index: 0, kind: input, shape index: {}]   ;;  %s2430_s1 = inlined_call_operand.hbm [shape: bf16[640,128], index: 1, kind: input, shape index: {}]   ;;  %s2431_s2 = inlined_call_operand.vmem [shape: f32[1,128], index: 2, kind: input, shape index: {}]   ;;  %s2432_s3 = inlined_call_operand.hbm [shape: f32[8,128], index: 3, kind: output, shape index: {}]  }
   0x1   :  { %9 = vsyncpa [#allocation6], 0 }
   0x2   :  { %10 = vsyncpa [#allocation4], 0  ;;  %s2139_s12 = smov [#allocation2]   ;;  %s2140_s14 = smov [#allocation5]  }
   0x3   :  { %s17_s13 = sshll.u32 %s2139_s12, 4  ;;  %s26_s15 = sshll.u32 %s2140_s14, 4  ;;  %s18_s13 = int_to_ptr.vmem [resolvable:$true] %s17_s13  ;;  %s27_s15 = int_to_ptr.vmem [resolvable:$true] %s26_s15 }
   0x4   :  { %s2081_s16 = scalar_lea.vmem %s18_s13, 128  ;;  %p2086_p1 = scmp.lt.s32.totalorder %s18_s13, %s18_s13 }
   0x5   :  { %p2082_p0 = scmp.ne.s32.totalorder %s18_s13, %s2081_s16  ;;  %p2087_p2 = scmp.lt.s32.totalorder %s2081_s16, %s2081_s16 }
   0x7   :  { %p2088_p3 = por %p2087_p2, %p2086_p1 }
   0x9   :  { %p2089_p4 = pnand %p2088_p3, %p2082_p0 }
   0xb   :  { %2092 = shalt.err (!%p2089_p4)
}
   0xc   :  { %20 = dma.hbm_to_vmem [thread:$0]  %s2429_s0, 128, %s18_s13, [#allocation3]  }
   0xd   :  { %s2101_s19 = scalar_lea.vmem %s27_s15, 5120  ;;  %p2106_p6 = scmp.lt.s32.totalorder %s27_s15, %s27_s15 }
   0xe   :  { %p2102_p5 = scmp.ne.s32.totalorder %s27_s15, %s2101_s19  ;;  %p2107_p7 = scmp.lt.s32.totalorder %s2101_s19, %s2101_s19 }
  0x10   :  { %p2108_p8 = por %p2107_p7, %p2106_p6 }
  0x12   :  { %p2109_p9 = pnand %p2108_p8, %p2102_p5 }
  0x14   :  { %2112 = shalt.err (!%p2109_p9)
}
  0x15   :  { %s2141_s20 = smov 64   ;;  %s2142_s21 = smov 4  }
  0x16   :  { %32 = dma.hbm_to_vmem [thread:$0]  %s2430_s1, 5120, %s27_s15, [#allocation6], %s2141_s20, %s2141_s20, %s2142_s21  }
  0x17   :  { %2133 = dma.done.wait [#allocation3], 128  }
  0x18   :  { %2134 = vsyncadd [#allocation3], 4294967168 }
  0x19   :  { %2135 = dma.done.wait [#allocation6], 5120  }
  0x1a   :  { %2136 = vsyncadd [#allocation6], 4294962176  ;;  %v43_v0 = vlaneseq  ;;  %v2177_v4 = vld [vmem:[#allocation2] sm:$0xff]  ;;  %v2037_v12 = vld [vmem:[#allocation5 + $0xf0] sm:$0xff]   ;;  %v2143_v53 = vmov 1983009808  }
  0x1b   :  { %v2033_v7 = vld [vmem:[#allocation5 + $0xf8] sm:$0xff]   ;;  %v2038_v14 = vld [vmem:[#allocation5 + $0x70] sm:$0xff]   ;;  %v2041_v18 = vld [vmem:[#allocation5 + $0xe8] sm:$0xff]   ;;  %v378_v54 = vunpack.c.l.s4 %v2143_v53  ;;  %v2144_v60 = vmov 0.0  }
  0x1c   :  { %v2173_v1 = vshrl.u32 %v43_v0, 7  ;;  %v2034_v9 = vld [vmem:[#allocation5 + $0x78] sm:$0xff]   ;;  %1916 = vmatprep.subr.bf16.mxu1 %v2033_v7  ;;  %v2039_v16 = vld [vmem:[#allocation5 + $0xb0] sm:$0xff]   ;;  %v2042_v20 = vld [vmem:[#allocation5 + $0x68] sm:$0xff]   ;;  %v2198_v52 = vand.u32 127, %v43_v0 }
  0x1d   :  { %v2035_v10 = vld [vmem:[#allocation5 + $0xb8] sm:$0xff]   ;;  %1864 = vmatprep.subr.bf16.mxu0 %v2034_v9  ;;  %v2040_v17 = vld [vmem:[#allocation5 + $0x30] sm:$0xff]   ;;  %v2043_v22 = vld [vmem:[#allocation5 + $0xa8] sm:$0xff]   ;;  %v379_v57 = vunpack.c.0.s8 %v378_v54 }
  0x1e   :  { %v56_v2 = vsub.s32 1, %v2173_v1  ;;  %v45_v3 = vsub.s32 0, %v2173_v1  ;;  %v67_v8 = vsub.s32 2, %v2173_v1  ;;  %v2036_v11 = vld [vmem:[#allocation5 + $0x38] sm:$0xff]   ;;  %1917 = vmatpush3.bf16.msra.mxu1 %v2035_v10  ;;  %v78_v13 = vsub.s32 3, %v2173_v1  ;;  %v2044_v23 = vld [vmem:[#allocation5 + $0x28] sm:$0xff]  }
  0x1f   :  { %1865 = vmatpush3.bf16.msra.mxu0 %v2036_v11  ;;  %1918 = vmatprep.subr.bf16.mxu1 %v2037_v12  ;;  %v89_v19 = vsub.s32 4, %v2173_v1  ;;  %v2045_v24 = vld [vmem:[#allocation5 + $0xe0] sm:$0xff]   ;;  %v100_v25 = vsub.s32 5, %v2173_v1  ;;  %v2049_v30 = vld [vmem:[#allocation5 + $0xd8] sm:$0xff]   ;;  %v111_v31 = vsub.s32 6, %v2173_v1  ;;  %v2053_v36 = vld [vmem:[#allocation5 + $0xd0] sm:$0xff]  }
  0x20   :  { %v57_v5 = vrot.slane %v2177_v4, %v56_v2  ;;  %v46_v6 = vrot.slane %v2177_v4, %v45_v3  ;;  %v68_v15 = vrot.slane %v2177_v4, %v67_v8  ;;  %1866 = vmatprep.subr.bf16.mxu0 %v2038_v14  ;;  %v79_v21 = vrot.slane %v2177_v4, %v78_v13  ;;  %v2046_v26 = vld [vmem:[#allocation5 + $0x60] sm:$0xff]   ;;  %v2050_v32 = vld [vmem:[#allocation5 + $0x58] sm:$0xff]   ;;  %v2054_v38 = vld [vmem:[#allocation5 + $0x50] sm:$0xff]  }
  0x21   :  { %v90_v27 = vrot.slane %v2177_v4, %v89_v19  ;;  %v2047_v28 = vld [vmem:[#allocation5 + $0xa0] sm:$0xff]   ;;  %v101_v33 = vrot.slane %v2177_v4, %v100_v25  ;;  %v2051_v34 = vld [vmem:[#allocation5 + $0x98] sm:$0xff]   ;;  %v122_v37 = vsub.s32 7, %v2173_v1  ;;  %v112_v39 = vrot.slane %v2177_v4, %v111_v31  ;;  %v2055_v40 = vld [vmem:[#allocation5 + $0x90] sm:$0xff]  }
  0x22   :  { %59 = vbcast.lane.b32.xlu1 %v57_v5, 256  ;;  %48 = vbcast.lane.b32.xlu0 %v46_v6, 256  ;;  %v2048_v29 = vld [vmem:[#allocation5 + $0x20] sm:$0xff]   ;;  %v2052_v35 = vld [vmem:[#allocation5 + $0x18] sm:$0xff]   ;;  %v2056_v41 = vld [vmem:[#allocation5 + $0x10] sm:$0xff]  }
  0x23   :  { %1919 = vmatpush3.bf16.msra.mxu1 %v2039_v16  ;;  %1867 = vmatpush3.bf16.msra.mxu0 %v2040_v17  ;;  %v2057_v42 = vld [vmem:[#allocation5 + $0xc8] sm:$0xff]   ;;  %v123_v44 = vrot.slane %v2177_v4, %v122_v37  ;;  %v2061_v47 = vld [vmem:[#allocation5 + $0xc0] sm:$0xff]   ;;  %v2193_v51 = vld [vmem:[#allocation5 + $0x138] sm:$0xff]   ;;  %v2213_v4 = vsub.s32 %v379_v57, %v2173_v1 }
  0x24   :  { %1920 = vmatprep.subr.bf16.mxu1 %v2041_v18  ;;  %1868 = vmatprep.subr.bf16.mxu0 %v2042_v20  ;;  %v2058_v43 = vld [vmem:[#allocation5 + $0x48] sm:$0xff]   ;;  %v2062_v48 = vld [vmem:[#allocation5 + $0x40] sm:$0xff]  }
  0x25   :  { %v2059_v45 = vld [vmem:[#allocation5 + $0x88] sm:$0xff]   ;;  %v2063_v49 = vld [vmem:[#allocation5 + $0x80] sm:$0xff]  }
  0x26   :  { %63 = vbcast.lane.b32.xlu1 %v57_v5, 264  ;;  %52 = vbcast.lane.b32.xlu0 %v46_v6, 264  ;;  %v2060_v46 = vld [vmem:[#allocation5 + $0x8] sm:$0xff]   ;;  %v2064_v50 = vld [vmem:[#allocation5] sm:$0xff]  }
  0x27   :  { %1921 = vmatpush3.bf16.msra.mxu1 %v2043_v22  ;;  %1869 = vmatpush3.bf16.msra.mxu0 %v2044_v23 }
  0x28   :  { %1922 = vmatprep.subr.bf16.mxu1 %v2045_v24  ;;  %1870 = vmatprep.subr.bf16.mxu0 %v2046_v26 }
  0x2a   :  { %74 = vbcast.lane.b32.xlu1 %v68_v15, 264  ;;  %70 = vbcast.lane.b32.xlu0 %v68_v15, 256 }
  0x2b   :  { %1923 = vmatpush3.bf16.msra.mxu1 %v2047_v28  ;;  %1871 = vmatpush3.bf16.msra.mxu0 %v2048_v29 }
  0x2c   :  { %1924 = vmatprep.subr.bf16.mxu1 %v2049_v30  ;;  %1872 = vmatprep.subr.bf16.mxu0 %v2050_v32 }
  0x2e   :  { %85 = vbcast.lane.b32.xlu1 %v79_v21, 264  ;;  %81 = vbcast.lane.b32.xlu0 %v79_v21, 256 }
  0x2f   :  { %1925 = vmatpush3.bf16.msra.mxu1 %v2051_v34  ;;  %1873 = vmatpush3.bf16.msra.mxu0 %v2052_v35 }
  0x30   :  { %1926 = vmatprep.subr.bf16.mxu1 %v2053_v36  ;;  %1874 = vmatprep.subr.bf16.mxu0 %v2054_v38 }
  0x32   :  { %96 = vbcast.lane.b32.xlu1 %v90_v27, 264  ;;  %92 = vbcast.lane.b32.xlu0 %v90_v27, 256 }
  0x33   :  { %1927 = vmatpush3.bf16.msra.mxu1 %v2055_v40  ;;  %1875 = vmatpush3.bf16.msra.mxu0 %v2056_v41 }
  0x34   :  { %1928 = vmatprep.subr.bf16.mxu1 %v2057_v42  ;;  %1876 = vmatprep.subr.bf16.mxu0 %v2058_v43 }
  0x36   :  { %107 = vbcast.lane.b32.xlu1 %v101_v33, 264  ;;  %103 = vbcast.lane.b32.xlu0 %v101_v33, 256 }
  0x37   :  { %1929 = vmatpush3.bf16.msra.mxu1 %v2059_v45  ;;  %1877 = vmatpush3.bf16.msra.mxu0 %v2060_v46 }
  0x38   :  { %1930 = vmatprep.subr.bf16.mxu1 %v2061_v47  ;;  %1878 = vmatprep.subr.bf16.mxu0 %v2062_v48 }
  0x3a   :  { %118 = vbcast.lane.b32.xlu1 %v112_v39, 264  ;;  %114 = vbcast.lane.b32.xlu0 %v112_v39, 256 }
  0x3b   :  { %1931 = vmatpush3.bf16.msra.mxu1 %v2063_v49  ;;  %1879 = vmatpush3.bf16.msra.mxu0 %v2064_v50 }
  0x3c   :  { %2010 = vmatprep.subr.bf16.mxu1 %v2193_v51  ;;  %1982 = vmatprep.subr.bf16.mxu0 %v2193_v51 }
  0x3e   :  { %129 = vbcast.lane.b32.xlu1 %v123_v44, 264  ;;  %125 = vbcast.lane.b32.xlu0 %v123_v44, 256 }
  0x94   :  { %v60_v55 = vpop.permute.xlu1 %59  ;;  %v49_v56 = vpop.permute.xlu0 %48 }
  0x95   :  { %vm135_vm0 = vcmp.eq.s32.totalorder %v60_v55, %v2198_v52  ;;  %vm133_vm1 = vcmp.eq.s32.totalorder %v49_v56, %v2198_v52 }
  0x96   :  { %v1793_v61 = vsel %vm135_vm0, 1.0, %v2144_v60  ;;  %v1791_v62 = vsel %vm133_vm1, 1.0, %v2144_v60  ;;  %vm1656_vm0 = vcmask 1043456   ;;  %vm1753_vm1 = vcmask 1041409  }
  0x98   :  { %v64_v58 = vpop.permute.xlu1 %63  ;;  %v53_v59 = vpop.permute.xlu0 %52 }
  0x99   :  { %vm136_vm2 = vcmp.eq.s32.totalorder %v64_v58, %v2198_v52  ;;  %vm134_vm3 = vcmp.eq.s32.totalorder %v53_v59, %v2198_v52 }
  0x9a   :  { %v1794_v63 = vsel %vm136_vm2, 1.0, %v2144_v60  ;;  %v1792_v0 = vsel %vm134_vm3, 1.0, %v2144_v60  ;;  %vm1756_vm2 = vcmask 1042434   ;;  %vm1759_vm3 = vcmask 1043459  }
  0x9b   :  { %v2208_v2 = vpack.c.bf16 %v1794_v63, %v1793_v61  ;;  %v2210_v3 = vpack.c.bf16 %v1792_v0, %v1791_v62 }
  0x9c   :  { %v75_v5 = vpop.permute.xlu1 %74  ;;  %v71_v6 = vpop.permute.xlu0 %70 }
  0x9d   :  { %vm138_vm4 = vcmp.eq.s32.totalorder %v75_v5, %v2198_v52  ;;  %vm137_vm5 = vcmp.eq.s32.totalorder %v71_v6, %v2198_v52  ;;  %v190_v7 = vshrl.u32 %v2210_v3, 16  ;;  %v192_v8 = vshll.u32 %v2210_v3, 16 }
  0x9e   :  { %v1796_v9 = vsel %vm138_vm4, 1.0, %v2144_v60  ;;  %v1795_v10 = vsel %vm137_vm5, 1.0, %v2144_v60  ;;  %v197_v11 = vshrl.u32 %v2208_v2, 16  ;;  %v199_v12 = vshll.u32 %v2208_v2, 16 }
  0x9f   :  { %v2223_v1 = vpack.c.bf16 %v1796_v9, %v1795_v10  ;;  %v194_v13 = vrot.slane %v192_v8, 1  ;;  %v254_v14 = vrot.slane %v2208_v2, 1  ;;  %v253_v15 = vrot.slane %v2210_v3, 1 }
  0xa0   :  { %v86_v16 = vpop.permute.xlu1 %85  ;;  %v82_v17 = vpop.permute.xlu0 %81  ;;  %v201_v18 = vrot.slane %v199_v12, 1  ;;  %v264_v19 = vrot.slane %v197_v11, 1  ;;  %v265_v20 = vrot.slane %v199_v12, 2  ;;  %v261_v21 = vrot.slane %v190_v7, 1 }
  0xa1   :  { %vm140_vm6 = vcmp.eq.s32.totalorder %v86_v16, %v2198_v52  ;;  %vm139_vm7 = vcmp.eq.s32.totalorder %v82_v17, %v2198_v52  ;;  %v195_v22 = vor.u32 %v194_v13, %v190_v7  ;;  %v262_v23 = vrot.slane %v192_v8, 2  ;;  %v2066_v16 = vld [vmem:[#allocation5 + $0x130] sm:$0xff]  }
  0xa2   :  { %v1798_v24 = vsel %vm140_vm6, 1.0, %v2144_v60  ;;  %v1797_v25 = vsel %vm139_vm7, 1.0, %v2144_v60  ;;  %v202_v26 = vor.u32 %v201_v18, %v197_v11  ;;  %v2231_v27 = vor.u32 %v265_v20, %v264_v19 }
  0xa3   :  { %v2233_v28 = vpack.c.bf16 %v1798_v24, %v1797_v25  ;;  %v373_v29 = vcombine.low %v2210_v3, %v195_v22  ;;  %v374_v30 = vcombine.high %v2210_v3, %v195_v22  ;;  %v263_v31 = vor.u32 %v262_v23, %v261_v21 }
  0xa4   :  { %v97_v32 = vpop.permute.xlu1 %96  ;;  %v93_v33 = vpop.permute.xlu0 %92  ;;  %v424_v34 = vcombine.low %v2208_v2, %v202_v26  ;;  %v426_v35 = vcombine.low %v254_v14, %v2231_v27  ;;  %v204_v36 = vshrl.u32 %v2223_v1, 16  ;;  %v206_v37 = vshll.u32 %v2223_v1, 16 }
  0xa5   :  { %vm142_vm8 = vcmp.eq.s32.totalorder %v97_v32, %v2198_v52  ;;  %vm141_vm9 = vcmp.eq.s32.totalorder %v93_v33, %v2198_v52  ;;  %v383_v38 = vrot.slane %v373_v29, %v2213_v4  ;;  %v390_v39 = vrot.slane %v374_v30, %v2213_v4 }
  0xa6   :  { %v1800_v40 = vsel %vm142_vm8, 1.0, %v2144_v60  ;;  %v1799_v41 = vsel %vm141_vm9, 1.0, %v2144_v60  ;;  %v434_v42 = vrot.slane %v424_v34, %v2213_v4  ;;  %v2251_v43 = vrot.slane %v426_v35, %v2213_v4 }
  0xa7   :  { %v2253_v44 = vpack.c.bf16 %v1800_v40, %v1799_v41  ;;  %v791_v45 = vrot.slane %v383_v38, %v2213_v4  ;;  %v375_v46 = vcombine.low %v253_v15, %v263_v31  ;;  %v376_v47 = vcombine.high %v253_v15, %v263_v31 }
  0xa8   :  { %v108_v48 = vpop.permute.xlu1 %107  ;;  %v104_v49 = vpop.permute.xlu0 %103  ;;  %v457_v50 = vcombine.high %v434_v42, %v2251_v43  ;;  %v1807_v53 = vcombine.low %v390_v39, %v434_v42  ;;  %v208_v54 = vrot.slane %v206_v37, 1  ;;  %v425_v55 = vcombine.high %v2208_v2, %v202_v26 }
  0xa9   :  { %vm144_vm10 = vcmp.eq.s32.totalorder %v108_v48, %v2198_v52  ;;  %vm143_vm11 = vcmp.eq.s32.totalorder %v104_v49, %v2198_v52  ;;  %v397_v56 = vrot.slane %v375_v46, %v2213_v4  ;;  %v404_v57 = vrot.slane %v376_v47, %v2213_v4 }
  0xaa   :  { %v1802_v58 = vsel %vm144_vm10, 1.0, %v2144_v60  ;;  %v1801_v59 = vsel %vm143_vm11, 1.0, %v2144_v60  ;;  %v805_v61 = vrot.slane %v1807_v53, %v2213_v4  ;;  %v2265_v62 = vor.u32 %v208_v54, %v204_v36 }
  0xab   :  { %v2267_v63 = vpack.c.bf16 %v1802_v58, %v1801_v59  ;;  %v1808_v0 = vcombine.low %v404_v57, %v2251_v43  ;;  %v798_v5 = vrot.slane %v397_v56, %v2213_v4  ;;  %v441_v6 = vrot.slane %v425_v55, %v2213_v4  ;;  %v2068_v55 = vld [vmem:[#allocation5 + $0x120] sm:$0xff]  }
  0xac   :  { %v119_v7 = vpop.permute.xlu1 %118  ;;  %v115_v8 = vpop.permute.xlu0 %114  ;;  %v814_v9 = vcombine.high %v791_v45, %v805_v61  ;;  %v813_v10 = vcombine.low %v791_v45, %v805_v61  ;;  %v475_v11 = vcombine.low %v2223_v1, %v2265_v62  ;;  %v255_v12 = vrot.slane %v2223_v1, 1 }
  0xad   :  { %vm146_vm12 = vcmp.eq.s32.totalorder %v119_v7, %v2198_v52  ;;  %vm145_vm13 = vcmp.eq.s32.totalorder %v115_v8, %v2198_v52  ;;  %v812_v13 = vrot.slane %v1808_v0, %v2213_v4  ;;  %v1809_v15 = vcombine.low %v457_v50, %v441_v6 }
  0xae   :  { %v1804_v17 = vsel %vm146_vm12, 1.0, %v2144_v60  ;;  %v1803_v18 = vsel %vm145_vm13, 1.0, %v2144_v60  ;;  %1401 = vmatprep.mubr.bf16.mxu0 %v814_v9  ;;  %v485_v19 = vrot.slane %v475_v11, %v2213_v4  ;;  %v267_v20 = vrot.slane %v204_v36, 1 }
  0xaf   :  { %v2281_v21 = vpack.c.bf16 %v1804_v17, %v1803_v18  ;;  %v816_v22 = vcombine.high %v798_v5, %v812_v13  ;;  %1402 = vmatmul.mubr.bf16.vlgmr.msra.gmra.mxu0 %v813_v10  ;;  %v815_v23 = vcombine.low %v798_v5, %v812_v13  ;;  %v844_v24 = vrot.slane %v1809_v15, %v2213_v4  ;;  %v2069_v18 = vld [vmem:[#allocation5 + $0x118] sm:$0xff]  }
  0xb0   :  { %v858_v25 = vrot.slane %v485_v19, %v2213_v4  ;;  %v268_v26 = vrot.slane %v206_v37, 2  ;;  %v427_v29 = vcombine.high %v254_v14, %v2231_v27  ;;  %1983 = vmatpush3.bf16.msra.mxu0 %v2193_v51  ;;  %v130_v30 = vpop.permute.xlu1 %129  ;;  %v126_v31 = vpop.permute.xlu0 %125  ;;  %v211_v32 = vshrl.u32 %v2233_v28, 16  ;;  %v2067_v37 = vld [vmem:[#allocation5 + $0x128] sm:$0xff]  }
  0xb1   :  { %1482 = vmatprep.mubr.bf16.mxu1 %v816_v22  ;;  %vm148_vm14 = vcmp.eq.s32.totalorder %v130_v30, %v2198_v52  ;;  %vm147_vm15 = vcmp.eq.s32.totalorder %v126_v31, %v2198_v52  ;;  %1984 = vmatprep.subr.bf16.mxu0 %v2066_v16  ;;  %v213_v33 = vshll.u32 %v2233_v28, 16  ;;  %v256_v34 = vrot.slane %v2233_v28, 1 }
  0xb2   :  { %1483 = vmatmul.mubr.bf16.vlgmr.msra.gmra.mxu1 %v815_v23  ;;  %v867_v35 = vcombine.high %v844_v24, %v858_v25  ;;  %v269_v36 = vor.u32 %v268_v26, %v267_v20  ;;  %v455_v14 = vrot.slane %v427_v29, %v2213_v4  ;;  %v1806_v27 = vsel %vm148_vm14, 1.0, %v2144_v60 }
  0xb3   :  { %2018 = vmatpush3.bf16.msra.mxu1 %v2193_v51  ;;  %v1805_v38 = vsel %vm147_vm15, 1.0, %v2144_v60  ;;  %v866_v39 = vcombine.low %v844_v24, %v858_v25  ;;  %v215_v40 = vrot.slane %v213_v33, 1  ;;  %v270_v52 = vrot.slane %v211_v32, 1 }
  0xb4   :  { %1409 = vmatprep.mubr.bf16.mxu0 %v867_v35  ;;  %v458_v41 = vcombine.low %v441_v6, %v455_v14  ;;  %v477_v42 = vcombine.low %v255_v12, %v269_v36  ;;  %v2298_v45 = vpack.c.bf16 %v1806_v27, %v1805_v38  ;;  %2011 = vmatprep.subr.bf16.mxu1 %v2066_v16  ;;  %v271_v46 = vrot.slane %v213_v33, 2  ;;  %v2070_v27 = vld [vmem:[#allocation5 + $0x110] sm:$0xff]  }
  0xb5   :  { %v216_v47 = vor.u32 %v215_v40, %v211_v32  ;;  %v476_v48 = vcombine.high %v2223_v1, %v2265_v62  ;;  %v478_v49 = vcombine.high %v255_v12, %v269_v36  ;;  %1985 = vmatpush3.bf16.msra.mxu0 %v2066_v16  ;;  %v218_v51 = vshrl.u32 %v2253_v44, 16 }
  0xb6   :  { %v499_v60 = vrot.slane %v477_v42, %v2213_v4  ;;  %v1810_v50 = vcombine.high %v2251_v43, %v458_v41  ;;  %v272_v53 = vor.u32 %v271_v46, %v270_v52  ;;  %1986 = vmatprep.subr.bf16.mxu0 %v2067_v37  ;;  %v220_v54 = vshll.u32 %v2253_v44, 16 }
  0xb7   :  { %2019 = vmatpush3.bf16.msra.mxu1 %v2066_v16  ;;  %1410 = vmatmul.mubr.bf16.gmra.mxu0 %v866_v39  ;;  %v492_v56 = vrot.slane %v476_v48, %v2213_v4  ;;  %v526_v57 = vcombine.low %v2233_v28, %v216_v47  ;;  %v527_v58 = vcombine.high %v2233_v28, %v216_v47  ;;  %v225_v59 = vshrl.u32 %v2267_v63, 16 }
  0xb8   :  { %v851_v61 = vrot.slane %v1810_v50, %v2213_v4  ;;  %v865_v62 = vrot.slane %v499_v60, %v2213_v4  ;;  %v528_v43 = vcombine.low %v256_v34, %v272_v53  ;;  %v506_v0 = vrot.slane %v478_v49, %v2213_v4  ;;  %2012 = vmatprep.subr.bf16.mxu1 %v2067_v37 }
  0xb9   :  { %v536_v5 = vrot.slane %v526_v57, %v2213_v4  ;;  %v543_v6 = vrot.slane %v527_v58, %v2213_v4  ;;  %v529_v7 = vcombine.high %v256_v34, %v272_v53  ;;  %1987 = vmatpush3.bf16.msra.mxu0 %v2067_v37  ;;  %v222_v8 = vrot.slane %v220_v54, 1 }
  0xba   :  { %v869_v9 = vcombine.high %v851_v61, %v865_v62  ;;  %v868_v10 = vcombine.low %v851_v61, %v865_v62  ;;  %v550_v11 = vrot.slane %v528_v43, %v2213_v4  ;;  %v227_v12 = vshll.u32 %v2267_v63, 16  ;;  %1988 = vmatprep.subr.bf16.mxu0 %v2068_v55 }
  0xbb   :  { %v1811_v13 = vcombine.low %v492_v56, %v536_v5  ;;  %v557_v15 = vrot.slane %v529_v7, %v2213_v4  ;;  %2020 = vmatpush3.bf16.msra.mxu1 %v2067_v37  ;;  %v223_v16 = vor.u32 %v222_v8, %v218_v51  ;;  %v276_v17 = vrot.slane %v225_v59, 1 }
  0xbc   :  { %1490 = vmatprep.mubr.bf16.mxu1 %v869_v9  ;;  %v559_v19 = vcombine.high %v536_v5, %v550_v11  ;;  %v1812_v20 = vcombine.low %v506_v0, %v550_v11  ;;  %v229_v22 = vrot.slane %v227_v12, 1  ;;  %v257_v23 = vrot.slane %v2253_v44, 1  ;;  %2013 = vmatprep.subr.bf16.mxu1 %v2068_v55 }
  0xbd   :  { %1491 = vmatmul.mubr.bf16.gmra.mxu1 %v868_v10  ;;  %v897_v24 = vrot.slane %v1811_v13, %v2213_v4  ;;  %v560_v25 = vcombine.low %v543_v6, %v557_v15  ;;  %v577_v26 = vcombine.low %v2253_v44, %v223_v16  ;;  %v578_v29 = vcombine.high %v2253_v44, %v223_v16 }
  0xbe   :  { %v1813_v30 = vcombine.low %v559_v19, %v543_v6  ;;  %v904_v31 = vrot.slane %v1812_v20, %v2213_v4  ;;  %v230_v32 = vor.u32 %v229_v22, %v225_v59  ;;  %v258_v33 = vrot.slane %v2267_v63, 1  ;;  %1989 = vmatpush3.bf16.msra.mxu0 %v2068_v55  ;;  %v2071_v59 = vld [vmem:[#allocation5 + $0x108] sm:$0xff]  }
  0xbf   :  { %v1814_v34 = vcombine.high %v550_v11, %v560_v25  ;;  %v587_v35 = vrot.slane %v577_v26, %v2213_v4  ;;  %v594_v36 = vrot.slane %v578_v29, %v2213_v4  ;;  %v273_v14 = vrot.slane %v218_v51, 1  ;;  %2021 = vmatpush3.bf16.msra.mxu1 %v2068_v55  ;;  %1990 = vmatprep.subr.bf16.mxu0 %v2069_v18 }
  0xc0   :  { %v911_v37 = vrot.slane %v1813_v30, %v2213_v4  ;;  %v628_v38 = vcombine.low %v2267_v63, %v230_v32  ;;  %v274_v39 = vrot.slane %v220_v54, 2  ;;  %v277_v40 = vrot.slane %v227_v12, 2  ;;  %2014 = vmatprep.subr.bf16.mxu1 %v2069_v18 }
  0xc1   :  { %v918_v52 = vrot.slane %v1814_v34, %v2213_v4  ;;  %v2330_v41 = vrot.slane %v587_v35, %v2213_v4  ;;  %v232_v42 = vshrl.u32 %v2281_v21, 16  ;;  %v234_v46 = vshll.u32 %v2281_v21, 16 }
  0xc2   :  { %v920_v47 = vcombine.high %v897_v24, %v911_v37  ;;  %v919_v48 = vcombine.low %v897_v24, %v911_v37  ;;  %v638_v49 = vrot.slane %v628_v38, %v2213_v4  ;;  %v275_v51 = vor.u32 %v274_v39, %v273_v14  ;;  %1991 = vmatpush3.bf16.msra.mxu0 %v2069_v18 }
  0xc3   :  { %v922_v60 = vcombine.high %v904_v31, %v918_v52  ;;  %v921_v50 = vcombine.low %v904_v31, %v918_v52  ;;  %v278_v53 = vor.u32 %v277_v40, %v276_v17  ;;  %2022 = vmatpush3.bf16.msra.mxu1 %v2069_v18  ;;  %v236_v54 = vrot.slane %v234_v46, 1  ;;  %1992 = vmatprep.subr.bf16.mxu0 %v2070_v27  ;;  %v2072_v18 = vld [vmem:[#allocation5 + $0x100] sm:$0xff]  }
  0xc4   :  { %1417 = vmatprep.mubr.bf16.mxu0 %v920_v47  ;;  %v1815_v55 = vcombine.low %v594_v36, %v638_v49  ;;  %v579_v56 = vcombine.low %v257_v23, %v275_v51  ;;  %v580_v57 = vcombine.high %v257_v23, %v275_v51  ;;  %v629_v58 = vcombine.high %v2267_v63, %v230_v32 }
  0xc5   :  { %1498 = vmatprep.mubr.bf16.mxu1 %v922_v60  ;;  %1418 = vmatmul.mubr.bf16.gmra.mxu0 %v919_v48  ;;  %v630_v61 = vcombine.low %v258_v33, %v278_v53  ;;  %v237_v62 = vor.u32 %v236_v54, %v232_v42  ;;  %v259_v43 = vrot.slane %v2281_v21, 1  ;;  %v279_v0 = vrot.slane %v232_v42, 1 }
  0xc6   :  { %1499 = vmatmul.mubr.bf16.gmra.mxu1 %v921_v50  ;;  %v964_v5 = vrot.slane %v1815_v55, %v2213_v4  ;;  %v601_v6 = vrot.slane %v579_v56, %v2213_v4  ;;  %v608_v7 = vrot.slane %v580_v57, %v2213_v4  ;;  %v645_v8 = vrot.slane %v629_v58, %v2213_v4 }
  0xc7   :  { %v652_v9 = vrot.slane %v630_v61, %v2213_v4  ;;  %v679_v10 = vcombine.low %v2281_v21, %v237_v62  ;;  %v280_v11 = vrot.slane %v234_v46, 2  ;;  %v631_v12 = vcombine.high %v258_v33, %v278_v53  ;;  %2015 = vmatprep.subr.bf16.mxu1 %v2070_v27  ;;  %1993 = vmatpush3.bf16.msra.mxu0 %v2070_v27 }
  0xc8   :  { %v973_v13 = vcombine.high %v2330_v41, %v964_v5  ;;  %v957_v15 = vrot.slane %v601_v6, %v2213_v4  ;;  %v972_v16 = vcombine.low %v2330_v41, %v964_v5  ;;  %2023 = vmatpush3.bf16.msra.mxu1 %v2070_v27  ;;  %v239_v17 = vshrl.u32 %v2298_v45, 16  ;;  %1994 = vmatprep.subr.bf16.mxu0 %v2071_v59 }
  0xc9   :  { %v1816_v19 = vcombine.low %v608_v7, %v652_v9  ;;  %v661_v20 = vcombine.high %v638_v49, %v652_v9  ;;  %v689_v22 = vrot.slane %v679_v10, %v2213_v4  ;;  %v281_v23 = vor.u32 %v280_v11, %v279_v0  ;;  %2016 = vmatprep.subr.bf16.mxu1 %v2071_v59 }
  0xca   :  { %1425 = vmatprep.mubr.bf16.mxu0 %v973_v13  ;;  %v659_v24 = vrot.slane %v631_v12, %v2213_v4  ;;  %v241_v25 = vshll.u32 %v2298_v45, 16  ;;  %v260_v26 = vrot.slane %v2298_v45, 1  ;;  %v282_v29 = vrot.slane %v239_v17, 1 }
  0xcb   :  { %v971_v30 = vrot.slane %v1816_v19, %v2213_v4  ;;  %v1817_v31 = vcombine.low %v661_v20, %v645_v8  ;;  %v1017_v32 = vrot.slane %v689_v22, %v2213_v4  ;;  %v681_v33 = vcombine.low %v259_v43, %v281_v23  ;;  %1995 = vmatpush3.bf16.msra.mxu0 %v2071_v59 }
  0xcc   :  { %v662_v34 = vcombine.low %v645_v8, %v659_v24  ;;  %v243_v35 = vrot.slane %v241_v25, 1  ;;  %v283_v36 = vrot.slane %v241_v25, 2  ;;  %v680_v14 = vcombine.high %v2281_v21, %v237_v62  ;;  %2024 = vmatpush3.bf16.msra.mxu1 %v2071_v59  ;;  %1996 = vmatprep.subr.bf16.mxu0 %v2072_v18 }
  0xcd   :  { %v975_v27 = vcombine.high %v957_v15, %v971_v30  ;;  %1426 = vmatmul.mubr.bf16.gmra.mxu0 %v972_v16  ;;  %v974_v37 = vcombine.low %v957_v15, %v971_v30  ;;  %v1003_v38 = vrot.slane %v1817_v31, %v2213_v4  ;;  %v703_v39 = vrot.slane %v681_v33, %v2213_v4 }
  0xce   :  { %v1818_v40 = vcombine.high %v652_v9, %v662_v34  ;;  %v244_v52 = vor.u32 %v243_v35, %v239_v17  ;;  %v284_v41 = vor.u32 %v283_v36, %v282_v29  ;;  %v696_v42 = vrot.slane %v680_v14, %v2213_v4  ;;  %2017 = vmatprep.subr.bf16.mxu1 %v2072_v18 }
  0xcf   :  { %1506 = vmatprep.mubr.bf16.mxu1 %v975_v27  ;;  %v1026_v46 = vcombine.high %v1003_v38, %v1017_v32  ;;  %v1024_v47 = vrot.slane %v703_v39, %v2213_v4  ;;  %v1025_v48 = vcombine.low %v1003_v38, %v1017_v32  ;;  %v682_v49 = vcombine.high %v259_v43, %v281_v23 }
  0xd0   :  { %1507 = vmatmul.mubr.bf16.gmra.mxu1 %v974_v37  ;;  %v1010_v51 = vrot.slane %v1818_v40, %v2213_v4  ;;  %v730_v60 = vcombine.low %v2298_v45, %v244_v52  ;;  %v731_v50 = vcombine.high %v2298_v45, %v244_v52  ;;  %v732_v53 = vcombine.low %v260_v26, %v284_v41 }
  0xd1   :  { %1433 = vmatprep.mubr.bf16.mxu0 %v1026_v46  ;;  %v710_v54 = vrot.slane %v682_v49, %v2213_v4  ;;  %v733_v55 = vcombine.high %v260_v26, %v284_v41  ;;  %v285_v56 = vrot.slane %v2210_v3, 2  ;;  %v286_v57 = vrot.slane %v2208_v2, 2  ;;  %2025 = vmatpush3.bf16.msra.mxu1 %v2072_v18 }
  0xd2   :  { %v1028_v58 = vcombine.high %v1010_v51, %v1024_v47  ;;  %v1027_v59 = vcombine.low %v1010_v51, %v1024_v47  ;;  %v740_v61 = vrot.slane %v730_v60, %v2213_v4  ;;  %v747_v62 = vrot.slane %v731_v50, %v2213_v4  ;;  %1997 = vmatpush3.bf16.msra.mxu0 %v2072_v18 }
  0xd3   :  { %v754_v43 = vrot.slane %v732_v53, %v2213_v4  ;;  %v761_v0 = vrot.slane %v733_v55, %v2213_v4  ;;  %v408_v5 = vcombine.high %v285_v56, %v285_v56  ;;  %v415_v6 = vrot.slane %v285_v56, %v2213_v4 }
  0xd4   :  { %1514 = vmatprep.mubr.bf16.mxu1 %v1028_v58  ;;  %v1819_v7 = vcombine.low %v696_v42, %v740_v61  ;;  %v459_v3 = vcombine.high %v286_v57, %v286_v57  ;;  %v466_v2 = vrot.slane %v286_v57, %v2213_v4  ;;  %v287_v8 = vrot.slane %v2223_v1, 2 }
  0xd5   :  { %1434 = vmatmul.mubr.bf16.gmra.mxu0 %v1025_v48  ;;  %v763_v9 = vcombine.high %v740_v61, %v754_v43  ;;  %v764_v10 = vcombine.low %v747_v62, %v761_v0  ;;  %v1820_v11 = vcombine.low %v710_v54, %v754_v43  ;;  %v422_v12 = vrot.slane %v408_v5, %v2213_v4 }
  0xd6   :  { %v1056_v13 = vrot.slane %v1819_v7, %v2213_v4  ;;  %v423_v15 = vcombine.high %v415_v6, %v415_v6  ;;  %v473_v16 = vrot.slane %v459_v3, %v2213_v4  ;;  %v474_v17 = vcombine.high %v466_v2, %v466_v2 }
  0xd7   :  { %v1821_v18 = vcombine.low %v763_v9, %v747_v62  ;;  %v1822_v19 = vcombine.high %v754_v43, %v764_v10  ;;  %v1063_v20 = vrot.slane %v1820_v11, %v2213_v4  ;;  %v818_v22 = vcombine.low %v422_v12, %v466_v2 }
  0xd8   :  { %1515 = vmatmul.mubr.bf16.gmra.mxu1 %v1027_v59  ;;  %v817_v23 = vcombine.low %v415_v6, %v423_v15  ;;  %v288_v1 = vrot.slane %v2233_v28, 2  ;;  %v510_v24 = vcombine.high %v287_v8, %v287_v8  ;;  %v517_v30 = vrot.slane %v287_v8, %v2213_v4 }
  0xd9   :  { %v1070_v25 = vrot.slane %v1821_v18, %v2213_v4  ;;  %v1077_v26 = vrot.slane %v1822_v19, %v2213_v4  ;;  %v832_v29 = vrot.slane %v818_v22, %v2213_v4  ;;  %v870_v28 = vcombine.low %v474_v17, %v473_v16 }
  0xda   :  { %v825_v31 = vrot.slane %v817_v23, %v2213_v4  ;;  %v524_v32 = vrot.slane %v510_v24, %v2213_v4  ;;  %v561_v33 = vcombine.high %v288_v1, %v288_v1  ;;  %v568_v34 = vrot.slane %v288_v1, %v2213_v4 }
  0xdb   :  { %v1079_v35 = vcombine.high %v1056_v13, %v1070_v25  ;;  %v1081_v36 = vcombine.high %v1063_v20, %v1077_v26  ;;  %v1078_v14 = vcombine.low %v1056_v13, %v1070_v25  ;;  %v1080_v27 = vcombine.low %v1063_v20, %v1077_v26 }
  0xdc   :  { %v575_v37 = vrot.slane %v561_v33, %v2213_v4  ;;  %v576_v38 = vcombine.high %v568_v34, %v568_v34  ;;  %v923_v39 = vcombine.low %v524_v32, %v568_v34  ;;  %v833_v40 = vcombine.low %v825_v31, %v832_v29 }
  0xdd   :  { %1441 = vmatprep.mubr.bf16.mxu0 %v1079_v35  ;;  %1522 = vmatprep.mubr.bf16.mxu1 %v1081_v36  ;;  %v525_v52 = vcombine.high %v517_v30, %v517_v30  ;;  %v289_v41 = vrot.slane %v2253_v44, 2  ;;  %v290_v42 = vrot.slane %v2267_v63, 2  ;;  %v291_v48 = vrot.slane %v2281_v21, 2 }
  0xde   :  { %1442 = vmatmul.mubr.bf16.gmra.mxu0 %v1078_v14  ;;  %v924_v46 = vcombine.low %v576_v38, %v575_v37  ;;  %v931_v47 = vrot.slane %v923_v39, %v2213_v4  ;;  %v292_v49 = vrot.slane %v2298_v45, 2  ;;  %v878_v59 = vrot.slane %v870_v28, %v2213_v4 }
  0xdf   :  { %1998 = vmatprep.mubr.bf16.mxu0 %v833_v40  ;;  %v871_v51 = vcombine.low %v517_v30, %v525_v52  ;;  %v612_v60 = vcombine.high %v289_v41, %v289_v41  ;;  %v619_v50 = vrot.slane %v289_v41, %v2213_v4  ;;  %v670_v53 = vrot.slane %v290_v42, %v2213_v4 }
  0xe0   :  { %1523 = vmatmul.mubr.bf16.gmra.mxu1 %v1080_v27  ;;  %v938_v44 = vrot.slane %v924_v46, %v2213_v4  ;;  %v663_v54 = vcombine.high %v290_v42, %v290_v42  ;;  %v721_v63 = vrot.slane %v291_v48, %v2213_v4  ;;  %v714_v55 = vcombine.high %v291_v48, %v291_v48 }
  0xe1   :  { %v885_v56 = vrot.slane %v871_v51, %v2213_v4  ;;  %v626_v21 = vrot.slane %v612_v60, %v2213_v4  ;;  %v627_v57 = vcombine.high %v619_v50, %v619_v50  ;;  %v678_v45 = vcombine.high %v670_v53, %v670_v53 }
  0xe2   :  { %v939_v58 = vcombine.low %v931_v47, %v938_v44  ;;  %v677_v61 = vrot.slane %v663_v54, %v2213_v4  ;;  %v729_v62 = vcombine.high %v721_v63, %v721_v63  ;;  %v728_v5 = vrot.slane %v714_v55, %v2213_v4 }
  0xe3   :  { %v976_v43 = vcombine.low %v619_v50, %v627_v57  ;;  %v977_v0 = vcombine.low %v626_v21, %v670_v53  ;;  %v765_v6 = vcombine.high %v292_v49, %v292_v49  ;;  %v886_v7 = vcombine.low %v878_v59, %v885_v56 }
  0xe4   :  { %2002 = vmatprep.mubr.bf16.mxu1 %v939_v58  ;;  %v1029_v3 = vcombine.low %v678_v45, %v677_v61  ;;  %v1030_v2 = vcombine.low %v721_v63, %v729_v62  ;;  %v772_v8 = vrot.slane %v292_v49, %v2213_v4  ;;  %vm1762_vm4 = vcmask 1044484  }
  0xe5   :  { %v984_v9 = vrot.slane %v976_v43, %v2213_v4  ;;  %v991_v10 = vrot.slane %v977_v0, %v2213_v4  ;;  %v779_v11 = vrot.slane %v765_v6, %v2213_v4  ;;  %vm1765_vm5 = vcmask 1045509  }
  0xe6   :  { %1999 = vmatmul.mubr.bf16.vlgmr.msra.gmra.mxu0 %v886_v7  ;;  %v1037_v12 = vrot.slane %v1029_v3, %v2213_v4  ;;  %v1044_v13 = vrot.slane %v1030_v2, %v2213_v4  ;;  %v780_v15 = vcombine.high %v772_v8, %v772_v8  ;;  %v1082_v17 = vcombine.low %v728_v5, %v772_v8 }
  0xe7   :  { %v992_v16 = vcombine.low %v984_v9, %v991_v10  ;;  %vm1768_vm6 = vcmask 1046534   ;;  %vm1771_vm7 = vcmask 1047559  }
  0xe8   :  { %v1045_v18 = vcombine.low %v1037_v12, %v1044_v13  ;;  %v1083_v19 = vcombine.low %v780_v15, %v779_v11  ;;  %v1090_v20 = vrot.slane %v1082_v17, %v2213_v4 }
  0xe9   :  { %2003 = vmatmul.mubr.bf16.vlgmr.msra.gmra.mxu1 %v992_v16 }
  0xea   :  { %2006 = vmatprep.mubr.bf16.mxu1 %v1045_v18  ;;  %v1097_v22 = vrot.slane %v1083_v19, %v2213_v4 }
  0xec   :  { %v1098_v23 = vcombine.low %v1090_v20, %v1097_v22 }
  0xf1   :  { %2007 = vmatmul.mubr.bf16.gmra.mxu1 %v1098_v23 }
 0x16f   :  { %v1880_v1 = vpop.f32.mrf.mxu0 }
 0x171   :  { %v1881_v24 = vpop.f32.mrf.mxu0 }
 0x172   :  { %v1932_v25 = vpop.f32.mrf.mxu1  ;;  %v1882_v5 = vadd.f32 %v1881_v24, %v1880_v1 }
 0x173   :  { %v1883_v26 = vpop.f32.mrf.mxu0 }
 0x174   :  { %v1933_v29 = vpop.f32.mrf.mxu1 }
 0x175   :  { %v1884_v30 = vpop.f32.mrf.mxu0  ;;  %v1934_v6 = vadd.f32 %v1933_v29, %v1932_v25 }
 0x176   :  { %v1935_v31 = vpop.f32.mrf.mxu1  ;;  %v1885_v2 = vadd.f32 %v1884_v30, %v1883_v26 }
 0x177   :  { %v1886_v32 = vpop.f32.mrf.mxu0  ;;  %v1485_v25 = vadd.f32 %v1934_v6, %v1882_v5 }
 0x178   :  { %v1936_v33 = vpop.f32.mrf.mxu1 }
 0x179   :  { %v1887_v34 = vpop.f32.mrf.mxu0  ;;  %v1937_v8 = vadd.f32 %v1936_v33, %v1935_v31 }
 0x17a   :  { %v1888_v7 = vadd.f32 %v1887_v34, %v1886_v32 }
 0x17b   :  { %v1889_v36 = vpop.f32.mrf.mxu0  ;;  %v1488_v32 = vadd.f32 %v1937_v8, %v1885_v2 }
 0x17d   :  { %v1938_v35 = vpop.f32.mrf.mxu1  ;;  %v1890_v27 = vpop.f32.mrf.mxu0 }
 0x17e   :  { %v1891_v13 = vadd.f32 %v1890_v27, %v1889_v36 }
 0x17f   :  { %v1939_v14 = vpop.f32.mrf.mxu1 }
 0x180   :  { %v1940_v3 = vadd.f32 %v1939_v14, %v1938_v35 }
 0x181   :  { %v1941_v28 = vpop.f32.mrf.mxu1 }
 0x182   :  { %v1493_v24 = vadd.f32 %v1940_v3, %v1888_v7 }
 0x183   :  { %v1942_v37 = vpop.f32.mrf.mxu1 }
 0x184   :  { %v1943_v15 = vadd.f32 %v1942_v37, %v1941_v28 }
 0x185   :  { %v1892_v38 = vpop.f32.mrf.mxu0 }
 0x186   :  { %v1944_v4 = vpop.f32.mrf.mxu1  ;;  %v1496_v14 = vadd.f32 %v1943_v15, %v1891_v13 }
 0x187   :  { %v1893_v39 = vpop.f32.mrf.mxu0 }
 0x188   :  { %v1945_v40 = vpop.f32.mrf.mxu1  ;;  %v1894_v16 = vadd.f32 %v1893_v39, %v1892_v38 }
 0x189   :  { %v1895_v52 = vpop.f32.mrf.mxu0  ;;  %v1946_v17 = vadd.f32 %v1945_v40, %v1944_v4 }
 0x18a   :  { %v1947_v41 = vpop.f32.mrf.mxu1 }
 0x18b   :  { %v1896_v42 = vpop.f32.mrf.mxu0  ;;  %v1501_v36 = vadd.f32 %v1946_v17, %v1894_v16 }
 0x18c   :  { %v1948_v46 = vpop.f32.mrf.mxu1  ;;  %v1897_v18 = vadd.f32 %v1896_v42, %v1895_v52 }
 0x18d   :  { %v1898_v47 = vpop.f32.mrf.mxu0  ;;  %v1949_v19 = vadd.f32 %v1948_v46, %v1947_v41 }
 0x18f   :  { %v1899_v48 = vpop.f32.mrf.mxu0  ;;  %v1504_v4 = vadd.f32 %v1949_v19, %v1897_v18 }
 0x190   :  { %v1950_v49 = vpop.f32.mrf.mxu1  ;;  %v1900_v9 = vadd.f32 %v1899_v48, %v1898_v47 }
 0x191   :  { %v1901_v51 = vpop.f32.mrf.mxu0 }
 0x192   :  { %v1951_v60 = vpop.f32.mrf.mxu1 }
 0x193   :  { %v1902_v50 = vpop.f32.mrf.mxu0  ;;  %v1952_v10 = vadd.f32 %v1951_v60, %v1950_v49 }
 0x194   :  { %v1953_v53 = vpop.f32.mrf.mxu1  ;;  %v1903_v23 = vadd.f32 %v1902_v50, %v1901_v51 }
 0x195   :  { %v1904_v44 = vpop.f32.mrf.mxu0  ;;  %v1509_v30 = vadd.f32 %v1952_v10, %v1900_v9 }
 0x196   :  { %v1954_v54 = vpop.f32.mrf.mxu1 }
 0x197   :  { %v1905_v63 = vpop.f32.mrf.mxu0  ;;  %v1955_v1 = vadd.f32 %v1954_v54, %v1953_v53 }
 0x198   :  { %v1956_v55 = vpop.f32.mrf.mxu1  ;;  %v1906_v29 = vadd.f32 %v1905_v63, %v1904_v44 }
 0x199   :  { %v1907_v56 = vpop.f32.mrf.mxu0  ;;  %v1512_v42 = vadd.f32 %v1955_v1, %v1903_v23 }
 0x19a   :  { %v1957_v21 = vpop.f32.mrf.mxu1 }
 0x19b   :  { %v1908_v57 = vpop.f32.mrf.mxu0  ;;  %v1958_v26 = vadd.f32 %v1957_v21, %v1956_v55 }
 0x19c   :  { %v2406_v45 = vpop.f32.mrf.mxu1  ;;  %v2410_v39 = vadd.f32 %v1908_v57, %v1907_v56 }
 0x19d   :  { %v1517_v51 = vadd.f32 %v1958_v26, %v1906_v29 }
 0x19e   :  { %v2408_v58 = vpop.f32.mrf.mxu1  ;;  %v1910_v59 = vpop.f32.mrf.mxu0 }
 0x19f   :  { %v1961_v16 = vadd.f32 %v2408_v58, %v2406_v45 }
 0x1a0   :  { %v1962_v61 = vpop.f32.mrf.mxu1  ;;  %v1911_v62 = vpop.f32.mrf.mxu0 }
 0x1a1   :  { %v1912_v28 = vadd.f32 %v1911_v62, %v1910_v59 }
 0x1a2   :  { %v1963_v43 = vpop.f32.mrf.mxu1  ;;  %v1913_v0 = vpop.f32.mrf.mxu0 }
 0x1a3   :  { %v1964_v27 = vadd.f32 %v1963_v43, %v1962_v61 }
 0x1a4   :  { %v1965_v11 = vpop.f32.mrf.mxu1  ;;  %v1914_v12 = vpop.f32.mrf.mxu0 }
 0x1a5   :  { %v1915_v46 = vadd.f32 %v1914_v12, %v1913_v0  ;;  %v1525_v59 = vadd.f32 %v1964_v27, %v1912_v28 }
 0x1a6   :  { %v1966_v20 = vpop.f32.mrf.mxu1  ;;  %v2000_v22 = vpop.f32.mrf.mxu0 }
 0x1a7   :  { %v1574_v33 = vadd.f32 %v2000_v22, %v1493_v24  ;;  %v1967_v63 = vadd.f32 %v1966_v20, %v1965_v11 }
 0x1a8   :  { %v1565_v31 = vpop.f32.mrf.mxu0 }
 0x1a9   :  { %v2004_v34 = vpop.f32.mrf.mxu1  ;;  %v1566_v35 = vadd.f32 %v1565_v31, %v1485_v25  ;;  %v1626_v60 = vcombine.high %v1574_v33, %v1574_v33  ;;  %v1528_v24 = vadd.f32 %v1967_v63, %v1915_v46 }
 0x1aa   :  { %v1590_v37 = vadd.f32 %v2004_v34, %v1509_v30  ;;  %v2001_v38 = vpop.f32.mrf.mxu0 }
 0x1ab   :  { %v1624_v40 = vcombine.high %v1566_v35, %v1566_v35  ;;  %v1581_v52 = vpop.f32.mrf.mxu1  ;;  %v1577_v41 = vadd.f32 %v2001_v38, %v1496_v14  ;;  %v1665_v3 = vsel %vm1656_vm0, %v1626_v60, -inf }
 0x1ac   :  { %v1630_v47 = vcombine.high %v1590_v37, %v1590_v37  ;;  %v1582_v48 = vadd.f32 %v1581_v52, %v1501_v36  ;;  %v1568_v49 = vpop.f32.mrf.mxu0 }
 0x1ad   :  { %v1640_v50 = vcombine.low %v1566_v35, %v1624_v40  ;;  %v1627_v53 = vcombine.high %v1577_v41, %v1577_v41  ;;  %v2005_v44 = vpop.f32.mrf.mxu1  ;;  %v1569_v54 = vadd.f32 %v1568_v49, %v1488_v32 }
 0x1ae   :  { %v1644_v55 = vcombine.low %v1590_v37, %v1630_v47  ;;  %v1593_v21 = vadd.f32 %v2005_v44, %v1512_v42  ;;  %v1628_v56 = vcombine.high %v1582_v48, %v1582_v48  ;;  %v1673_v0 = vsel %vm1656_vm0, %v1582_v48, -inf }
 0x1af   :  { %v1642_v57 = vcombine.low %v1577_v41, %v1627_v53  ;;  %v1625_v61 = vcombine.high %v1569_v54, %v1569_v54  ;;  %v1657_v62 = vsel %vm1656_vm0, %v1569_v54, -inf  ;;  %v1584_v43 = vpop.f32.mrf.mxu1  ;;  %v1520_v48 = vadd.f32 %v1961_v16, %v2410_v39  ;;  %v1863_v39 = vld [vmem:[%s2431_s2] ss:$0 sm:$0xff]  ;;  %s2145_s2 = smov [#allocation7]  }
 0x1b0   :  { %v1689_v5 = vsel %vm1656_vm0, %v1593_v21, -inf  ;;  %v1658_v6 = vmax.f32 %v1640_v50, %v1657_v62  ;;  %v1585_v7 = vadd.f32 %v1584_v43, %v1504_v4  ;;  %v1631_v22 = vcombine.high %v1593_v21, %v1593_v21  ;;  %s1781_s24 = sshll.u32 %s2145_s2, 4  ;;  %s1782_s24 = int_to_ptr.vmem [resolvable:$true] %s1781_s24 }
 0x1b1   :  { %v1674_v2 = vmax.f32 %v1642_v57, %v1673_v0  ;;  %v1690_v8 = vmax.f32 %v1644_v55, %v1689_v5  ;;  %v1641_v9 = vcombine.low %v1625_v61, %v1574_v33  ;;  %v2008_v10 = vpop.f32.mrf.mxu1  ;;  %s2113_s25 = scalar_lea.vmem %s1782_s24, 128  ;;  %p2118_p11 = scmp.lt.s32.totalorder %s1782_s24, %s1782_s24 }
 0x1b2   :  { %v1659_v11 = vrot.slane %v1658_v6, 4  ;;  %v1629_v12 = vcombine.high %v1585_v7, %v1585_v7  ;;  %v1643_v13 = vcombine.low %v1628_v56, %v1585_v7  ;;  %v1606_v15 = vadd.f32 %v2008_v10, %v1525_v59  ;;  %p2114_p10 = scmp.ne.s32.totalorder %s1782_s24, %s2113_s25  ;;  %p2119_p12 = scmp.lt.s32.totalorder %s2113_s25, %s2113_s25 }
 0x1b3   :  { %v1675_v17 = vrot.slane %v1674_v2, 4  ;;  %v1691_v18 = vrot.slane %v1690_v8, 4  ;;  %v1666_v19 = vmax.f32 %v1641_v9, %v1665_v3  ;;  %v1597_v20 = vpop.f32.mrf.mxu1 }
 0x1b4   :  { %v1660_v23 = vmax.f32 %v1658_v6, %v1659_v11  ;;  %v1681_v1 = vsel %vm1656_vm0, %v1629_v12, -inf  ;;  %v1634_v33 = vcombine.high %v1606_v15, %v1606_v15  ;;  %v1598_v34 = vadd.f32 %v1597_v20, %v1517_v51  ;;  %p2120_p13 = por %p2119_p12, %p2118_p11 }
 0x1b5   :  { %v1676_v25 = vmax.f32 %v1674_v2, %v1675_v17  ;;  %v1692_v29 = vmax.f32 %v1690_v8, %v1691_v18  ;;  %v1667_v26 = vrot.slane %v1666_v19, 4  ;;  %v1682_v30 = vmax.f32 %v1643_v13, %v1681_v1  ;;  %v2009_v31 = vpop.f32.mrf.mxu1 }
 0x1b6   :  { %v1661_v32 = vrot.slane %v1660_v23, 2  ;;  %v1609_v35 = vadd.f32 %v2009_v31, %v1528_v24  ;;  %v1632_v27 = vcombine.high %v1598_v34, %v1598_v34  ;;  %v1645_v37 = vcombine.low %v1631_v22, %v1598_v34  ;;  %p2121_p0 = pnand %p2120_p13, %p2114_p10 }
 0x1b7   :  { %v1677_v36 = vrot.slane %v1676_v25, 2  ;;  %v1693_v45 = vrot.slane %v1692_v29, 2  ;;  %v1668_v58 = vmax.f32 %v1666_v19, %v1667_v26  ;;  %v1683_v14 = vrot.slane %v1682_v30, 4  ;;  %v1600_v41 = vpop.f32.mrf.mxu1 }
 0x1b8   :  { %v1662_v28 = vmax.f32 %v1660_v23, %v1661_v32  ;;  %v1635_v38 = vcombine.high %v1609_v35, %v1609_v35  ;;  %v1697_v42 = vsel %vm1656_vm0, %v1632_v27, -inf  ;;  %v1647_v46 = vcombine.low %v1634_v33, %v1609_v35 }
 0x1b9   :  { %v1678_v4 = vmax.f32 %v1676_v25, %v1677_v36  ;;  %v1669_v40 = vrot.slane %v1668_v58, 2  ;;  %v1684_v52 = vmax.f32 %v1682_v30, %v1683_v14  ;;  %v1694_v53 = vmax.f32 %v1692_v29, %v1693_v45 }
 0x1ba   :  { %v1713_v47 = vsel %vm1656_vm0, %v1635_v38, -inf  ;;  %v1663_v51 = vrot.slane %v1662_v28, 1  ;;  %v1698_v44 = vmax.f32 %v1645_v37, %v1697_v42  ;;  %v1601_v63 = vadd.f32 %v1600_v41, %v1520_v48 }
 0x1bb   :  { %v1679_v49 = vrot.slane %v1678_v4, 1  ;;  %v1670_v60 = vmax.f32 %v1668_v58, %v1669_v40  ;;  %v1685_v50 = vrot.slane %v1684_v52, 2  ;;  %v1714_v54 = vmax.f32 %v1647_v46, %v1713_v47 }
 0x1bc   :  { %v1699_v56 = vrot.slane %v1698_v44, 4  ;;  %v1633_v61 = vcombine.high %v1601_v63, %v1601_v63  ;;  %v1664_v62 = vmax.f32 %v1662_v28, %v1663_v51  ;;  %v1695_v5 = vrot.slane %v1694_v53, 1 }
 0x1bd   :  { %v1671_v55 = vrot.slane %v1670_v60, 1  ;;  %v1686_v21 = vmax.f32 %v1684_v52, %v1685_v50  ;;  %v1680_v59 = vmax.f32 %v1678_v4, %v1679_v49  ;;  %v1715_v57 = vrot.slane %v1714_v54, 4 }
 0x1be   :  { %v1700_v6 = vmax.f32 %v1698_v44, %v1699_v56  ;;  %v1646_v3 = vcombine.low %v1601_v63, %v1633_v61  ;;  %v1705_v9 = vsel %vm1656_vm0, %v1606_v15, -inf  ;;  %v1728_v16 = vadd.f32 %v1863_v39, %v1664_v62 }
 0x1bf   :  { %v1672_v43 = vmax.f32 %v1670_v60, %v1671_v55  ;;  %v1687_v0 = vrot.slane %v1686_v21, 1  ;;  %v1716_v7 = vmax.f32 %v1714_v54, %v1715_v57  ;;  %v1730_v10 = vadd.f32 %v1863_v39, %v1680_v59 }
 0x1c0   :  { %v1701_v11 = vrot.slane %v1700_v6, 2  ;;  %v1706_v13 = vmax.f32 %v1646_v3, %v1705_v9  ;;  %v1696_v18 = vmax.f32 %v1694_v53, %v1695_v5  ;;  %v1736_v30 = vmax.f32 %v1728_v16, 0.0 }
 0x1c1   :  { %v1729_v2 = vadd.f32 %v1863_v39, %v1672_v43  ;;  %v1688_v8 = vmax.f32 %v1686_v21, %v1687_v0  ;;  %v1717_v12 = vrot.slane %v1716_v7, 2  ;;  %v1738_v24 = vmax.f32 %v1730_v10, 0.0 }
 0x1c2   :  { %v1702_v19 = vmax.f32 %v1700_v6, %v1701_v11  ;;  %v1707_v22 = vrot.slane %v1706_v13, 4  ;;  %v1732_v31 = vadd.f32 %v1863_v39, %v1696_v18 }
 0x1c3   :  { %v1737_v17 = vmax.f32 %v1729_v2, 0.0  ;;  %v1718_v20 = vmax.f32 %v1716_v7, %v1717_v12  ;;  %v1731_v1 = vadd.f32 %v1863_v39, %v1688_v8  ;;  %v1755_v36 = vrot.slane %v1738_v24, 6 }
 0x1c4   :  { %v1703_v25 = vrot.slane %v1702_v19, 1  ;;  %v1708_v26 = vmax.f32 %v1706_v13, %v1707_v22  ;;  %v1740_v14 = vmax.f32 %v1732_v31, 0.0 }
 0x1c5   :  { %v1752_v23 = vrot.slane %v1737_v17, 7  ;;  %v1719_v29 = vrot.slane %v1718_v20, 1  ;;  %v1739_v33 = vmax.f32 %v1731_v1, 0.0 }
 0x1c6   :  { %v1704_v15 = vmax.f32 %v1702_v19, %v1703_v25  ;;  %v1709_v32 = vrot.slane %v1708_v26, 2  ;;  %v1761_v41 = vrot.slane %v1740_v14, 4 }
 0x1c7   :  { %v1720_v34 = vmax.f32 %v1718_v20, %v1719_v29  ;;  %v1754_v35 = vsel %vm1753_vm1, %v1752_v23, %v1736_v30  ;;  %v1758_v37 = vrot.slane %v1739_v33, 5 }
 0x1c8   :  { %v1733_v45 = vadd.f32 %v1863_v39, %v1704_v15  ;;  %v1710_v58 = vmax.f32 %v1708_v26, %v1709_v32  ;;  %v1757_v27 = vsel %vm1756_vm2, %v1755_v36, %v1754_v35 }
 0x1c9   :  { %v1735_v38 = vadd.f32 %v1863_v39, %v1720_v34  ;;  %v1760_v52 = vsel %vm1759_vm3, %v1758_v37, %v1757_v27 }
 0x1ca   :  { %v1711_v28 = vrot.slane %v1710_v58, 1  ;;  %v1741_v4 = vmax.f32 %v1733_v45, 0.0  ;;  %v1763_v49 = vsel %vm1762_vm4, %v1761_v41, %v1760_v52 }
 0x1cb   :  { %v1743_v46 = vmax.f32 %v1735_v38, 0.0 }
 0x1cc   :  { %v1712_v40 = vmax.f32 %v1710_v58, %v1711_v28  ;;  %v1764_v47 = vrot.slane %v1741_v4, 3 }
 0x1cd   :  { %v1770_v50 = vrot.slane %v1743_v46, 1 }
 0x1ce   :  { %v1734_v42 = vadd.f32 %v1863_v39, %v1712_v40  ;;  %v1766_v60 = vsel %vm1765_vm5, %v1764_v47, %v1763_v49 }
 0x1d0   :  { %v1742_v48 = vmax.f32 %v1734_v42, 0.0 }
 0x1d2   :  { %v1767_v51 = vrot.slane %v1742_v48, 2 }
 0x1d4   :  { %v1769_v53 = vsel %vm1768_vm6, %v1767_v51, %v1766_v60 }
 0x1d5   :  { %v1772_v44 = vsel %vm1771_vm7, %v1770_v50, %v1769_v53 }
 0x1d6   :  { %1774 = vst [vmem:[#allocation7] sm:$0xff] %v1772_v44 }
 0x1d7   :  { %2124 = shalt.err (!%p2121_p0)
}
 0x1d8   :  { %1784 = dma.vmem_to_hbm [thread:$0]  %s1782_s24, 128, %s2432_s3, [#allocation4]  }
 0x1d9   :  { %2137 = dma.done.wait [#allocation4], 128  }
 0x1da   :  { %2138 = vsyncadd [#allocation4], 4294967168 }
 0x1db   :  { %1788 = vsyncpa [#allocation3], 1 }
 0x1dc   :  { %1789 = vsyncpa [#allocation6], 1 }
 0x1dd   :  { %1790 = vsyncpa [#allocation4], 1 }

</bundles_post_ra>
